<compile_context>
chip_gen: v6e
topology: v6e:2x2x1
jax: 0.10.0
libtpu: 0.0.40
codegen_flags: <defaults>
</compile_context>

<pallas_src>
import jax
import jax.numpy as jnp
from jax.experimental import pallas as pl
from jax.experimental.pallas import tpu as pltpu


def _round_up(n: int, m: int) -> int:
    return ((n + m - 1) // m) * m


def _vmem_limit(need_bytes: int) -> int:
    """Scoped-VMEM limit: ~25% headroom, >= the 32 MiB default, <= 100 MiB."""
    return int(min(max(need_bytes * 5 // 4, 32 * 1024 * 1024),
                   100 * 1024 * 1024))


# ---------------------------------------------------------------------------
# Kernels
# ---------------------------------------------------------------------------
def _mlp_kernel(x_ref, w1_ref, b1_ref, w2_ref, b2_ref, o_ref):
    """Fused fc1 -> ReLU -> fc2 on a (TB, D_pad) activation tile.

    Both matmuls accumulate in f32 on the MXU; bias + ReLU run in f32 on the
    VPU (f32 epilogue is correct & free next to the matmuls on all chips).
    """
    h = jnp.dot(x_ref[...], w1_ref[...], preferred_element_type=jnp.float32)
    h = jnp.maximum(h + b1_ref[...], 0.0)                 # (TB,Hp) + (1,Hp)
    out = jnp.dot(h.astype(w2_ref.dtype), w2_ref[...],
                  preferred_element_type=jnp.float32)
    o_ref[...] = (out + b2_ref[...]).astype(o_ref.dtype)


def _mlp_stream_kernel(x_ref, w1_ref, b1_ref, w2_ref, b2_ref, o_ref, acc_ref):
    """H-tiled weight-streaming variant: grid = (batch tiles, H tiles).

    Per H tile: h_tile = relu(x @ w1[:, hs] + b1[hs]); acc += h_tile @ w2[hs].
    acc is f32 VMEM scratch carried across the (last, "arbitrary") H axis;
    output (+ b2) is written on the last H tile only.
    """
    h_idx = pl.program_id(1)

    @pl.when(h_idx == 0)
    def _():
        acc_ref[...] = jnp.zeros_like(acc_ref)

    h = jnp.dot(x_ref[...], w1_ref[...], preferred_element_type=jnp.float32)
    h = jnp.maximum(h + b1_ref[...], 0.0)
    acc_ref[...] += jnp.dot(h.astype(w2_ref.dtype), w2_ref[...],
                            preferred_element_type=jnp.float32)

    @pl.when(h_idx == pl.num_programs(1) - 1)
    def _():
        o_ref[...] = (acc_ref[...] + b2_ref[...]).astype(o_ref.dtype)


# ---------------------------------------------------------------------------
# Parameter preparation (hoisted out of the per-call forward path)
# ---------------------------------------------------------------------------
def prepare_masking_policy_params(w1, b1, w2, b2, T, F, *,
                                  compute_dtype=jnp.bfloat16):
    """Pad & cast the MaskingPolicy parameters ONCE.

    w1: (T*F, H) = fc1.weight.T      b1: (H,)   = fc1.bias
    w2: (H, T*F) = fc2.weight.T      b2: (T*F,) = fc2.bias

    Returns (w1_p, b1_p, w2_p, b2_p), lane-padded to multiples of 128.  The
    zero padding is mathematically inert: padded x columns hit zero w1 rows,
    padded hidden lanes have zero bias and zero w2 rows, and padded batch
    rows / output columns are sliced off by the wrapper.
    """
    D = T * F
    H = w1.shape[1]
    assert w1.shape == (D, H) and w2.shape == (H, D)
    D_pad = _round_up(D, 128)
    H_pad = _round_up(H, 128)
    w1_p = jnp.pad(w1.astype(compute_dtype), ((0, D_pad - D), (0, H_pad - H)))
    w2_p = jnp.pad(w2.astype(compute_dtype), ((0, H_pad - H), (0, D_pad - D)))
    # Biases stay f32 -- they feed the f32 epilogue.
    b1_p = jnp.pad(b1.astype(jnp.float32).reshape(1, H), ((0, 0), (0, H_pad - H)))
    b2_p = jnp.pad(b2.astype(jnp.float32).reshape(1, D), ((0, 0), (0, D_pad - D)))
    return w1_p, b1_p, w2_p, b2_p


# Cached: does pipeline_mode=pl.Buffered(1) lower on this jax/Mosaic version?
_WEIGHT_SINGLE_BUFFER_OK = None


# ---------------------------------------------------------------------------
# Forward wrapper
# ---------------------------------------------------------------------------
def masking_policy_forward(x, params, T, F, *, batch_tile=256,
                           vmem_budget_bytes=40 * 1024 * 1024, mode="auto"):
    """MaskingPolicy forward: x (B, T, F) -> logits (B, T, F) float32.

    `params` comes from prepare_masking_policy_params (padded & cast once).
    mode: "auto" | "single" (no grid) | "resident" (batch grid, weights
    VMEM-resident) | "stream" (batch x H grid, weights streamed).
    """
    w1_p, b1_p, w2_p, b2_p = params
    compute_dtype = w1_p.dtype
    B = x.shape[0]
    D = T * F
    D_pad, H_pad = w1_p.shape
    itemsize = w1_p.dtype.itemsize

    # Adaptive batch tile (multiple of the sublane group) -> minimal padded
    # batch waste; ~256-512 rows keeps mem-bound tiles near the HBM roofline.
    sub = 8 if compute_dtype == jnp.float32 else 16
    if B <= batch_tile:
        TB = _round_up(B, sub)
    else:
        TB = _round_up(pl.cdiv(B, pl.cdiv(B, batch_tile)), sub)
    B_pad = _round_up(B, TB)
    num_b = B_pad // TB

    # Only the activations are padded per call (weights were prepared once).
    x_p = jnp.pad(x.reshape(B, D).astype(compute_dtype),
                  ((0, B_pad - B), (0, D_pad - D)))
    out_shape = jax.ShapeDtypeStruct((B_pad, D_pad), jnp.float32)

    # VMEM byte accounting drives both path selection and vmem_limit_bytes.
    w_bytes = 2 * D_pad * H_pad * itemsize                 # w1 + w2
    bias_bytes = (H_pad + D_pad) * 4
    io_tile_bytes = 2 * TB * D_pad * (itemsize + 4)        # x & out, 2 buffers
    need_single = B_pad * D_pad * (itemsize + 4) + w_bytes + bias_bytes
    need_resident = 2 * w_bytes + 2 * bias_bytes + io_tile_bytes  # 2x: dbl buf

    if mode == "auto":
        if num_b == 1 and need_single <= vmem_budget_bytes:
            mode = "single"
        elif need_resident <= vmem_budget_bytes:
            mode = "resident"
        else:
            mode = "stream"

    if mode == "single":
        # Whole (padded) problem in VMEM: no grid, no pipeline prologue.
        vspec = pl.BlockSpec(memory_space=pltpu.MemorySpace.VMEM)
        out_p = pl.pallas_call(
            _mlp_kernel,
            out_shape=out_shape,
            in_specs=[vspec] * 5,
            out_specs=vspec,
            compiler_params=pltpu.CompilerParams(
                vmem_limit_bytes=_vmem_limit(need_single)),
        )(x_p, w1_p, b1_p, w2_p, b2_p)

    elif mode == "resident":
        # Batch-tiled grid; weights/biases stay VMEM-resident (constant index
        # maps -> DMA'd once).  The "parallel" batch axis uses both v7x
        # TensorCores; NOTE(v7x): for tiny-B weight-DMA-bound shapes this
        # duplicates the weight fetch per core -- use "arbitrary" if that
        # dominates.
        def call(single_buffer_weights):
            wkw = ({"pipeline_mode": pl.Buffered(1)}
                   if single_buffer_weights else {})
            return pl.pallas_call(
                _mlp_kernel,
                out_shape=out_shape,
                grid=(num_b,),
                in_specs=[
                    pl.BlockSpec((TB, D_pad), lambda i: (i, 0)),
                    pl.BlockSpec((D_pad, H_pad), lambda i: (0, 0), **wkw),
                    pl.BlockSpec((1, H_pad), lambda i: (0, 0), **wkw),
                    pl.BlockSpec((H_pad, D_pad), lambda i: (0, 0), **wkw),
                    pl.BlockSpec((1, D_pad), lambda i: (0, 0), **wkw),
                ],
                out_specs=pl.BlockSpec((TB, D_pad), lambda i: (i, 0)),
                compiler_params=pltpu.CompilerParams(
                    dimension_semantics=("parallel",),
                    vmem_limit_bytes=_vmem_limit(need_resident)),
            )(x_p, w1_p, b1_p, w2_p, b2_p)

        global _WEIGHT_SINGLE_BUFFER_OK
        if _WEIGHT_SINGLE_BUFFER_OK is None:
            try:
                # Weight blocks never change index -> single-buffer them so
                # the resident footprint is 1x rather than 2x.
                out_p = jax.block_until_ready(call(True))
                _WEIGHT_SINGLE_BUFFER_OK = True
            except Exception:
                # pl.Buffered(1) unsupported here; constant index maps still
                # avoid re-DMA, only the VMEM footprint doubles (budgeted
                # conservatively in need_resident).
                _WEIGHT_SINGLE_BUFFER_OK = False
                out_p = call(False)
        else:
            out_p = call(_WEIGHT_SINGLE_BUFFER_OK)

    elif mode == "stream":
        # H-tiled weight streaming: largest H tile (multiple of 128, dividing
        # H_pad) whose double-buffered weight slices + IO tiles + accumulator
        # fit the budget.
        acc_bytes = TB * D_pad * 4

        def need_stream(th):
            return (2 * 2 * D_pad * th * itemsize     # w1 & w2 slices, 2 bufs
                    + 2 * (th + D_pad) * 4            # bias slices
                    + io_tile_bytes + acc_bytes)

        TH = 128
        for th in range(H_pad, 0, -128):
            if H_pad % th == 0 and need_stream(th) <= vmem_budget_bytes:
                TH = th
                break
        num_h = H_pad // TH
        # TODO(synk): also tile D_pad / shrink TB if even TH=128 overflows the
        # budget (very large T*F).

        out_p = pl.pallas_call(
            _mlp_stream_kernel,
            out_shape=out_shape,
            grid=(num_b, num_h),
            in_specs=[
                pl.BlockSpec((TB, D_pad), lambda i, h: (i, 0)),
                pl.BlockSpec((D_pad, TH), lambda i, h: (0, h)),
                pl.BlockSpec((1, TH), lambda i, h: (0, h)),
                pl.BlockSpec((TH, D_pad), lambda i, h: (h, 0)),
                pl.BlockSpec((1, D_pad), lambda i, h: (0, 0)),
            ],
            out_specs=pl.BlockSpec((TB, D_pad), lambda i, h: (i, 0)),
            scratch_shapes=[pltpu.VMEM((TB, D_pad), jnp.float32)],
            compiler_params=pltpu.CompilerParams(
                dimension_semantics=("parallel", "arbitrary"),
                vmem_limit_bytes=_vmem_limit(need_stream(TH))),
        )(x_p, w1_p, b1_p, w2_p, b2_p)

    else:
        raise ValueError(f"unknown mode: {mode!r}")

    return out_p[:B, :D].reshape(B, T, F)


# ---------------------------------------------------------------------------
# Self-test
# ---------------------------------------------------------------------------
if __name__ == "__main__":
    def reference(x, w1, b1, w2, b2, T, F):
        xf = x.reshape(x.shape[0], T * F)
        h = jnp.maximum(
            jnp.dot(xf, w1, precision=jax.lax.Precision.HIGHEST) + b1, 0.0)
        out = jnp.dot(h, w2, precision=jax.lax.Precision.HIGHEST) + b2
        return out.reshape(x.shape[0], T, F)

    def make_inputs(key, B, T, F, H):
        D = T * F
        kx, k1, k2, k3, k4 = jax.random.split(key, 5)
        x = jax.random.normal(kx, (B, T, F), dtype=jnp.float32)
        # PyTorch Linear stores (out, in); we hold the transposed (in, out).
        w1 = jax.random.normal(k1, (D, H), dtype=jnp.float32) * 0.1  # fc1.weight.T
        b1 = jax.random.normal(k2, (H,), dtype=jnp.float32) * 0.1    # fc1.bias
        w2 = jax.random.normal(k3, (H, D), dtype=jnp.float32) * 0.1  # fc2.weight.T
        b2 = jax.random.normal(k4, (D,), dtype=jnp.float32) * 0.1    # fc2.bias
        return x, w1, b1, w2, b2

    # 1) Nominal MaskingPolicy shape -- f32 params, single-VMEM-block path.
    B, T, F, H = 2, 8, 4, 64
    x, w1, b1, w2, b2 = make_inputs(jax.random.PRNGKey(0), B, T, F, H)
    ref = reference(x, w1, b1, w2, b2, T, F)
    p_f32 = prepare_masking_policy_params(w1, b1, w2, b2, T, F,
                                          compute_dtype=jnp.float32)
    out = jax.block_until_ready(masking_policy_forward(x, p_f32, T, F))
    assert out.shape == (B, T, F)
    # 2e-2 covers the case where "default" matmul precision maps f32 operands
    # to bf16 MXU passes; structural bugs would be O(1) off.
    assert jnp.allclose(out, ref, atol=2e-2, rtol=2e-2), "f32 single-block path"

    # 2) Same shape, default bf16 MXU operands (f32 accumulation/epilogue).
    p_bf16 = prepare_masking_policy_params(w1, b1, w2, b2, T, F)
    out_bf16 = jax.block_until_ready(masking_policy_forward(x, p_bf16, T, F))
    assert jnp.allclose(out_bf16, ref, atol=1e-1, rtol=1e-1), \
        "bf16 single-block path"

    # 3) Batch-tiled grid path, VMEM-resident (single-buffered) weights.
    B3 = 40
    x3, w1, b1, w2, b2 = make_inputs(jax.random.PRNGKey(1), B3, T, F, H)
    ref3 = reference(x3, w1, b1, w2, b2, T, F)
    p3 = prepare_masking_policy_params(w1, b1, w2, b2, T, F)
    out3 = jax.block_until_ready(
        masking_policy_forward(x3, p3, T, F, batch_tile=16, mode="resident"))
    assert jnp.allclose(out3, ref3, atol=1e-1, rtol=1e-1), "resident grid path"

    # 4) H-tiled weight-streaming path (accumulator + pl.when init/finalize).
    #    Tiny vmem budget forces TH=128 -> 2 H tiles, exercising accumulation.
    B4, T4, F4, H4 = 24, 8, 16, 256
    x4, w1, b1, w2, b2 = make_inputs(jax.random.PRNGKey(2), B4, T4, F4, H4)
    ref4 = reference(x4, w1, b1, w2, b2, T4, F4)
    p4 = prepare_masking_policy_params(w1, b1, w2, b2, T4, F4)
    out4 = jax.block_until_ready(
        masking_policy_forward(x4, p4, T4, F4, batch_tile=16, mode="stream",
                               vmem_budget_bytes=256 * 1024))
    assert jnp.allclose(out4, ref4, atol=1e-1, rtol=1e-1), \
        "weight-streaming path"

    print("KERNEL_OK")
</pallas_src>

<mosaic_0001>
module attributes {stable_mosaic.version = 11 : i64} {
  func.func @_mlp_kernel(%arg0: memref<8x128xf32, #tpu.memory_space<vmem>>, %arg1: memref<128x128xf32, #tpu.memory_space<vmem>>, %arg2: memref<1x128xf32, #tpu.memory_space<vmem>>, %arg3: memref<128x128xf32, #tpu.memory_space<vmem>>, %arg4: memref<1x128xf32, #tpu.memory_space<vmem>>, %arg5: memref<8x128xf32, #tpu.memory_space<vmem>>) attributes {dimension_semantics = [], scalar_prefetch = 0 : i64, scratch_operands = 0 : i64, tpu.core_type = #tpu.core_type<tc>} {
    %c0 = arith.constant 0 : index
    %c0_0 = arith.constant 0 : index
    %0 = vector.load %arg0[%c0, %c0_0] : memref<8x128xf32, #tpu.memory_space<vmem>>, vector<8x128xf32>
    %c0_1 = arith.constant 0 : index
    %c0_2 = arith.constant 0 : index
    %1 = vector.load %arg1[%c0_1, %c0_2] : memref<128x128xf32, #tpu.memory_space<vmem>>, vector<128x128xf32>
    %cst = arith.constant dense<0.000000e+00> : vector<8x128xf32>
    %2 = tpu.matmul %0, %1, %cst {dimension_numbers = #tpu.dot_dimension_numbers<[1], [0], [0], [1], [0, 0, 1, 1], [], []>} : vector<8x128xf32>, vector<128x128xf32>, vector<8x128xf32> -> vector<8x128xf32>
    %c0_3 = arith.constant 0 : index
    %c0_4 = arith.constant 0 : index
    %3 = vector.load %arg2[%c0_3, %c0_4] : memref<1x128xf32, #tpu.memory_space<vmem>>, vector<1x128xf32>
    %4 = vector.broadcast %3 : vector<1x128xf32> to vector<8x128xf32>
    %5 = arith.addf %2, %4 : vector<8x128xf32>
    %cst_5 = arith.constant 0.000000e+00 : f32
    %6 = vector.broadcast %cst_5 : f32 to vector<8x128xf32>
    %7 = arith.maximumf %5, %6 : vector<8x128xf32>
    %c0_6 = arith.constant 0 : index
    %c0_7 = arith.constant 0 : index
    %8 = vector.load %arg3[%c0_6, %c0_7] : memref<128x128xf32, #tpu.memory_space<vmem>>, vector<128x128xf32>
    %cst_8 = arith.constant dense<0.000000e+00> : vector<8x128xf32>
    %9 = tpu.matmul %7, %8, %cst_8 {dimension_numbers = #tpu.dot_dimension_numbers<[1], [0], [0], [1], [0, 0, 1, 1], [], []>} : vector<8x128xf32>, vector<128x128xf32>, vector<8x128xf32> -> vector<8x128xf32>
    %c0_9 = arith.constant 0 : index
    %c0_10 = arith.constant 0 : index
    %10 = vector.load %arg4[%c0_9, %c0_10] : memref<1x128xf32, #tpu.memory_space<vmem>>, vector<1x128xf32>
    %11 = vector.broadcast %10 : vector<1x128xf32> to vector<8x128xf32>
    %12 = arith.addf %9, %11 : vector<8x128xf32>
    %c0_11 = arith.constant 0 : index
    %c0_12 = arith.constant 0 : index
    %13 = vector.load %arg5[%c0_11, %c0_12] : memref<8x128xf32, #tpu.memory_space<vmem>>, vector<8x128xf32>
    tpu.vector_store %arg5[%c0_11, %c0_12], %12 {strides = array<i32>} : memref<8x128xf32, #tpu.memory_space<vmem>>, vector<8x128xf32>,
    return
  }
}

</mosaic_0001>

<bundles_post_ra>
// kernel: tpu_custom_call.1
= control target key start
LH: loop header
LB: loop body
LE: loop exit
PB: predicated region body
PF: predicated region fallthrough
CT: control target
= control target key end

     0   :  { %10 = vsyncpa [#allocation3], 0  ;;  %s555_s0 = inlined_call_operand.hbm [shape: f32[8,128], index: 0, kind: input, shape index: {}]   ;;  %s556_s1 = inlined_call_operand.hbm [shape: f32[128,128], index: 1, kind: input, shape index: {}]   ;;  %s557_s2 = inlined_call_operand.vmem [shape: f32[1,128], index: 2, kind: input, shape index: {}]   ;;  %s558_s3 = inlined_call_operand.hbm [shape: f32[128,128], index: 3, kind: input, shape index: {}]   ;;  %s559_s4 = inlined_call_operand.vmem [shape: f32[1,128], index: 4, kind: input, shape index: {}]   ;;  %s560_s5 = inlined_call_operand.hbm [shape: f32[8,128], index: 5, kind: output, shape index: {}]  }
   0x1   :  { %11 = vsyncpa [#allocation6], 0 }
   0x2   :  { %12 = vsyncpa [#allocation4], 0  ;;  %s465_s18 = smov [#allocation5]  }
   0x3   :  { %s28_s19 = sshll.u32 %s465_s18, 4  ;;  %s29_s19 = int_to_ptr.vmem [resolvable:$true] %s28_s19 }
   0x4   :  { %s387_s20 = scalar_lea.vmem %s29_s19, 2048  ;;  %p392_p1 = scmp.lt.s32.totalorder %s29_s19, %s29_s19 }
   0x5   :  { %p388_p0 = scmp.ne.s32.totalorder %s29_s19, %s387_s20  ;;  %p393_p2 = scmp.lt.s32.totalorder %s387_s20, %s387_s20 }
   0x7   :  { %p394_p3 = por %p393_p2, %p392_p1 }
   0x9   :  { %p395_p4 = pnand %p394_p3, %p388_p0 }
   0xb   :  { %398 = shalt.err (!%p395_p4)
}
   0xc   :  { %s466_s21 = smov 128   ;;  %s467_s22 = smov 8  }
   0xd   :  { %34 = dma.hbm_to_vmem [thread:$0]  %s556_s1, 2048, %s29_s19, [#allocation6], %s466_s21, %s466_s21, %s467_s22  }
   0xe   :  { %s468_s25 = smov [#allocation2]   ;;  %s469_s27 = smov [#allocation7]  }
   0xf   :  { %s19_s26 = sshll.u32 %s468_s25, 4  ;;  %s42_s28 = sshll.u32 %s469_s27, 4  ;;  %s20_s26 = int_to_ptr.vmem [resolvable:$true] %s19_s26  ;;  %s43_s28 = int_to_ptr.vmem [resolvable:$true] %s42_s28 }
  0x10   :  { %s407_s29 = scalar_lea.vmem %s20_s26, 128  ;;  %p412_p6 = scmp.lt.s32.totalorder %s20_s26, %s20_s26 }
  0x11   :  { %p408_p5 = scmp.ne.s32.totalorder %s20_s26, %s407_s29  ;;  %p413_p7 = scmp.lt.s32.totalorder %s407_s29, %s407_s29 }
  0x13   :  { %p414_p8 = por %p413_p7, %p412_p6 }
  0x15   :  { %p415_p9 = pnand %p414_p8, %p408_p5 }
  0x17   :  { %418 = shalt.err (!%p415_p9)
}
  0x18   :  { %22 = dma.hbm_to_vmem [thread:$0]  %s555_s0, 128, %s20_s26, [#allocation3]  }
  0x19   :  { %s427_s7 = scalar_lea.vmem %s43_s28, 2048  ;;  %p432_p11 = scmp.lt.s32.totalorder %s43_s28, %s43_s28 }
  0x1a   :  { %p428_p10 = scmp.ne.s32.totalorder %s43_s28, %s427_s7  ;;  %p433_p12 = scmp.lt.s32.totalorder %s427_s7, %s427_s7 }
  0x1c   :  { %p434_p13 = por %p433_p12, %p432_p11 }
  0x1e   :  { %p435_p0 = pnand %p434_p13, %p428_p10 }
  0x20   :  { %438 = shalt.err (!%p435_p0)
}
  0x21   :  { %48 = dma.hbm_to_vmem [thread:$0]  %s558_s3, 2048, %s43_s28, [#allocation6], %s466_s21, %s466_s21, %s467_s22  }
  0x22   :  { %459 = dma.done.wait [#allocation3], 128  }
  0x23   :  { %460 = vsyncadd [#allocation3], 4294967168 }
  0x24   :  { %461 = dma.done.wait [#allocation6], 4096  }
  0x25   :  { %462 = vsyncadd [#allocation6], 4294963200  ;;  %v470_v0 = vmov 0.0   ;;  %vm471_vm0 = vmmov 0   ;;  %v76_v1 = vld [vmem:[#allocation5 + $0x78] sm:$0xff]  ;;  %v75_v2 = vld [vmem:[#allocation5 + $0x70] sm:$0xff] }
  0x26   :  { %301 = vmatprep.subr.mxu0 %v470_v0  ;;  %333 = vmatprep.mubr.msk.f32.mxu0 %vm471_vm0, %v470_v0  ;;  %v74_v3 = vld [vmem:[#allocation5 + $0x68] sm:$0xff]  ;;  %v73_v4 = vld [vmem:[#allocation5 + $0x60] sm:$0xff]  ;;  %v170_v5 = vld [vmem:[#allocation7 + $0x78] sm:$0xff]  ;;  %s472_s11 = smov [#allocation8]  }
  0x27   :  { %336 = vmatprep.subr.mxu1 %v470_v0  ;;  %368 = vmatprep.mubr.msk.f32.mxu1 %vm471_vm0, %v470_v0  ;;  %v72_v6 = vld [vmem:[#allocation5 + $0x58] sm:$0xff]  ;;  %v169_v7 = vld [vmem:[#allocation7 + $0x70] sm:$0xff]  ;;  %v168_v8 = vld [vmem:[#allocation7 + $0x68] sm:$0xff]  ;;  %s255_s12 = sshll.u32 %s472_s11, 4  ;;  %s256_s12 = int_to_ptr.vmem [resolvable:$true] %s255_s12 }
  0x28   :  { %302 = vmatpush3.msra.mxu0 %v76_v1  ;;  %337 = vmatpush3.msra.mxu1 %v170_v5  ;;  %v71_v9 = vld [vmem:[#allocation5 + $0x50] sm:$0xff]  ;;  %v167_v10 = vld [vmem:[#allocation7 + $0x60] sm:$0xff]  ;;  %v70_v11 = vld [vmem:[#allocation5 + $0x48] sm:$0xff]  ;;  %s439_s13 = scalar_lea.vmem %s256_s12, 128  ;;  %p444_p2 = scmp.lt.s32.totalorder %s256_s12, %s256_s12 }
  0x29   :  { %303 = vmatprep.subr.mxu0 %v470_v0  ;;  %338 = vmatprep.subr.mxu1 %v470_v0  ;;  %v166_v12 = vld [vmem:[#allocation7 + $0x58] sm:$0xff]  ;;  %v69_v13 = vld [vmem:[#allocation5 + $0x40] sm:$0xff]  ;;  %v165_v14 = vld [vmem:[#allocation7 + $0x50] sm:$0xff]  ;;  %p440_p1 = scmp.ne.s32.totalorder %s256_s12, %s439_s13  ;;  %p445_p3 = scmp.lt.s32.totalorder %s439_s13, %s439_s13 }
  0x2a   :  { %304 = vmatpush3.msra.mxu0 %v75_v2  ;;  %339 = vmatpush3.msra.mxu1 %v169_v7  ;;  %v68_v15 = vld [vmem:[#allocation5 + $0x38] sm:$0xff]  ;;  %v164_v16 = vld [vmem:[#allocation7 + $0x48] sm:$0xff]  ;;  %v67_v17 = vld [vmem:[#allocation5 + $0x30] sm:$0xff] }
  0x2b   :  { %305 = vmatprep.subr.mxu0 %v470_v0  ;;  %340 = vmatprep.subr.mxu1 %v470_v0  ;;  %v163_v18 = vld [vmem:[#allocation7 + $0x40] sm:$0xff]  ;;  %v66_v19 = vld [vmem:[#allocation5 + $0x28] sm:$0xff]  ;;  %v162_v20 = vld [vmem:[#allocation7 + $0x38] sm:$0xff]  ;;  %p446_p4 = por %p445_p3, %p444_p2 }
  0x2c   :  { %306 = vmatpush3.msra.mxu0 %v74_v3  ;;  %341 = vmatpush3.msra.mxu1 %v168_v8  ;;  %v65_v21 = vld [vmem:[#allocation5 + $0x20] sm:$0xff]  ;;  %v161_v22 = vld [vmem:[#allocation7 + $0x30] sm:$0xff]  ;;  %v64_v23 = vld [vmem:[#allocation5 + $0x18] sm:$0xff] }
  0x2d   :  { %307 = vmatprep.subr.mxu0 %v470_v0  ;;  %342 = vmatprep.subr.mxu1 %v470_v0  ;;  %v160_v24 = vld [vmem:[#allocation7 + $0x28] sm:$0xff]  ;;  %v63_v25 = vld [vmem:[#allocation5 + $0x10] sm:$0xff]  ;;  %v159_v26 = vld [vmem:[#allocation7 + $0x20] sm:$0xff]  ;;  %p447_p5 = pnand %p446_p4, %p440_p1 }
  0x2e   :  { %308 = vmatpush3.msra.mxu0 %v73_v4  ;;  %343 = vmatpush3.msra.mxu1 %v167_v10  ;;  %v62_v27 = vld [vmem:[#allocation5 + $0x8] sm:$0xff]  ;;  %v158_v28 = vld [vmem:[#allocation7 + $0x18] sm:$0xff]  ;;  %v61_v29 = vld [vmem:[#allocation5] sm:$0xff] }
  0x2f   :  { %309 = vmatprep.subr.mxu0 %v470_v0  ;;  %344 = vmatprep.subr.mxu1 %v470_v0  ;;  %v60_v30 = vld [vmem:[#allocation2] sm:$0xff]  ;;  %v157_v31 = vld [vmem:[#allocation7 + $0x10] sm:$0xff]  ;;  %v156_v32 = vld [vmem:[#allocation7 + $0x8] sm:$0xff] }
  0x30   :  { %310 = vmatpush3.msra.mxu0 %v72_v6  ;;  %345 = vmatpush3.msra.mxu1 %v166_v12  ;;  %v155_v33 = vld [vmem:[#allocation7] sm:$0xff]  ;;  %v265_v34 = vld [vmem:[%s557_s2] ss:$0 sm:$0xff] }
  0x31   :  { %311 = vmatprep.subr.mxu0 %v470_v0  ;;  %346 = vmatprep.subr.mxu1 %v470_v0  ;;  %v266_v39 = vld [vmem:[%s559_s4] ss:$0 sm:$0xff] }
  0x32   :  { %312 = vmatpush3.msra.mxu0 %v71_v9  ;;  %347 = vmatpush3.msra.mxu1 %v165_v14 }
  0x33   :  { %313 = vmatprep.subr.mxu0 %v470_v0  ;;  %348 = vmatprep.subr.mxu1 %v470_v0 }
  0x34   :  { %314 = vmatpush3.msra.mxu0 %v70_v11  ;;  %349 = vmatpush3.msra.mxu1 %v164_v16 }
  0x35   :  { %315 = vmatprep.subr.mxu0 %v470_v0  ;;  %350 = vmatprep.subr.mxu1 %v470_v0 }
  0x36   :  { %316 = vmatpush3.msra.mxu0 %v69_v13  ;;  %351 = vmatpush3.msra.mxu1 %v163_v18 }
  0x37   :  { %317 = vmatprep.subr.mxu0 %v470_v0  ;;  %352 = vmatprep.subr.mxu1 %v470_v0 }
  0x38   :  { %318 = vmatpush3.msra.mxu0 %v68_v15  ;;  %353 = vmatpush3.msra.mxu1 %v162_v20 }
  0x39   :  { %319 = vmatprep.subr.mxu0 %v470_v0  ;;  %354 = vmatprep.subr.mxu1 %v470_v0 }
  0x3a   :  { %320 = vmatpush3.msra.mxu0 %v67_v17  ;;  %355 = vmatpush3.msra.mxu1 %v161_v22 }
  0x3b   :  { %321 = vmatprep.subr.mxu0 %v470_v0  ;;  %356 = vmatprep.subr.mxu1 %v470_v0 }
  0x3c   :  { %322 = vmatpush3.msra.mxu0 %v66_v19  ;;  %357 = vmatpush3.msra.mxu1 %v160_v24 }
  0x3d   :  { %323 = vmatprep.subr.mxu0 %v470_v0  ;;  %358 = vmatprep.subr.mxu1 %v470_v0 }
  0x3e   :  { %324 = vmatpush3.msra.mxu0 %v65_v21  ;;  %359 = vmatpush3.msra.mxu1 %v159_v26 }
  0x3f   :  { %325 = vmatprep.subr.mxu0 %v470_v0  ;;  %360 = vmatprep.subr.mxu1 %v470_v0 }
  0x40   :  { %326 = vmatpush3.msra.mxu0 %v64_v23  ;;  %361 = vmatpush3.msra.mxu1 %v158_v28 }
  0x41   :  { %327 = vmatprep.subr.mxu0 %v470_v0  ;;  %362 = vmatprep.subr.mxu1 %v470_v0 }
  0x42   :  { %328 = vmatpush3.msra.mxu0 %v63_v25  ;;  %363 = vmatpush3.msra.mxu1 %v157_v31 }
  0x43   :  { %329 = vmatprep.subr.mxu0 %v470_v0  ;;  %364 = vmatprep.subr.mxu1 %v470_v0 }
  0x44   :  { %330 = vmatpush3.msra.mxu0 %v62_v27  ;;  %365 = vmatpush3.msra.mxu1 %v156_v32 }
  0x45   :  { %331 = vmatprep.subr.mxu0 %v470_v0  ;;  %366 = vmatprep.subr.mxu1 %v470_v0 }
  0x46   :  { %332 = vmatpush3.msra.mxu0 %v61_v29  ;;  %367 = vmatpush3.msra.mxu1 %v155_v33 }
  0x47   :  { %334 = vmatmul.mubr.f32.vlgmr.msra.gmra.mxu0 %v60_v30 }
 0x107   :  { %v150_v35 = vpop.f32.mrf.mxu0 }
 0x108   :  { %v151_v36 = vadd.f32 %v265_v34, %v150_v35 }
 0x109   :  { %v335_v37 = vpop.f32.mrf.mxu0 }
 0x10a   :  { %v154_v38 = vmax.f32 %v151_v36, 0.0 }
 0x10c   :  { %369 = vmatmul.mubr.f32.vlgmr.msra.gmra.mxu1 %v154_v38 }
 0x1cc   :  { %v244_v40 = vpop.f32.mrf.mxu1 }
 0x1cd   :  { %v245_v41 = vadd.f32 %v266_v39, %v244_v40 }
 0x1ce   :  { %v370_v42 = vpop.f32.mrf.mxu1 }
 0x1cf   :  { %248 = vst [vmem:[#allocation8] sm:$0xff] %v245_v41 }
 0x1d0   :  { %450 = shalt.err (!%p447_p5)
}
 0x1d1   :  { %258 = dma.vmem_to_hbm [thread:$0]  %s256_s12, 128, %s560_s5, [#allocation4]  }
 0x1d2   :  { %463 = dma.done.wait [#allocation4], 128  }
 0x1d3   :  { %464 = vsyncadd [#allocation4], 4294967168 }
 0x1d4   :  { %262 = vsyncpa [#allocation3], 1 }
 0x1d5   :  { %263 = vsyncpa [#allocation6], 1 }
 0x1d6   :  { %264 = vsyncpa [#allocation4], 1 }

</bundles_post_ra>
